<compile_context>
chip_gen: v6e
topology: v6e:2x2x1
jax: 0.10.0
libtpu: 0.0.40
codegen_flags: <defaults>
</compile_context>

<pallas_src>
import numpy as np

import jax
import jax.numpy as jnp
from jax.experimental import pallas as pl
from jax.experimental.pallas import tpu as pltpu

EPS = 1e-5

_VMEM_SPEC = pl.BlockSpec(memory_space=pltpu.MemorySpace.VMEM)


# ----------------------------------------------------------------------------
# In-kernel helpers
# ----------------------------------------------------------------------------
def _bn_scale_shift(acc, gamma, beta, cred, cspread, inv_n):
    """Training-mode BN as a per-lane scale/shift (two-pass, f32 statistics).

    acc     : (B*H, W*C) f32 conv accumulator (channels minor in lanes).
    gamma   : (1, C), beta : (1, C)
    cred    : (W*C, C) one-hot matrix reducing the W lane-groups per channel.
    cspread : (C, W*C) one-hot matrix broadcasting per-channel values to lanes.
    Returns (scale, shift) of shape (1, W*C) so that BN(x) = x*scale + shift.
    """
    # Pass 1: per-channel mean.
    s1 = jnp.sum(acc, axis=0, keepdims=True)                                 # (1, W*C)
    mean_c = jnp.dot(s1, cred, preferred_element_type=jnp.float32) * inv_n   # (1, C)
    mean_l = jnp.dot(mean_c, cspread, preferred_element_type=jnp.float32)    # (1, W*C)
    # Pass 2: centered (biased) variance -- avoids E[x^2]-E[x]^2 cancellation.
    d = acc - mean_l
    s2 = jnp.sum(d * d, axis=0, keepdims=True)                               # (1, W*C)
    var_c = jnp.dot(s2, cred, preferred_element_type=jnp.float32) * inv_n    # (1, C)
    scale_c = gamma * jax.lax.rsqrt(var_c + EPS)                             # EUP rsqrt
    shift_c = beta - mean_c * scale_c
    scale = jnp.dot(scale_c, cspread, preferred_element_type=jnp.float32)
    shift = jnp.dot(shift_c, cspread, preferred_element_type=jnp.float32)
    return scale, shift


# ----------------------------------------------------------------------------
# Fused Pallas kernel
# ----------------------------------------------------------------------------
def residual_block_kernel(x_ref, w1_ref, w2_ref, g1_ref, b1_ref, g2_ref, b2_ref,
                          cred_ref, cspread_ref, o_ref):
    B, H, WC = x_ref.shape
    C = g1_ref.shape[-1]
    M = B * H
    inv_n = 1.0 / float(M * (WC // C))   # static: 1 / (N*H*W)

    cred = cred_ref[...]
    cspread = cspread_ref[...]

    # Row-within-image index; zeroes the H-padding rows after the rolls (and
    # kills the batch-to-batch wraparound of rolling the flattened (M, WC)).
    row = jax.lax.broadcasted_iota(jnp.int32, (B, H, WC), 1).reshape(M, WC)
    top = row == 0
    bot = row == H - 1

    def conv3x3(src, w_ref):
        """'same' 3x3 conv as three banded MXU matmuls (one per H tap).

        src   : (M, W*C) f32 activation (W and C folded into the lane axis).
        w_ref : (3, W*Cin, W*Cout) bf16 banded weights (W taps baked in).
        H taps are register-built via XLU rolls + boundary masks -- no VMEM
        scratch, no partial stores, bf16 operands with f32 accumulation.
        """
        up = jnp.where(top, 0.0, pltpu.roll(src, shift=1, axis=0))       # x[h-1]
        dn = jnp.where(bot, 0.0, pltpu.roll(src, shift=M - 1, axis=0))   # x[h+1]
        acc = jnp.dot(up.astype(jnp.bfloat16), w_ref[0],
                      preferred_element_type=jnp.float32)
        acc += jnp.dot(src.astype(jnp.bfloat16), w_ref[1],
                       preferred_element_type=jnp.float32)
        acc += jnp.dot(dn.astype(jnp.bfloat16), w_ref[2],
                       preferred_element_type=jnp.float32)
        return acc

    # ---- conv1 -> bn1 -> relu (all in VMEM / registers) ----
    acc1 = conv3x3(x_ref[...].reshape(M, WC), w1_ref)
    sc1, sh1 = _bn_scale_shift(acc1, g1_ref[...], b1_ref[...], cred, cspread, inv_n)
    y1 = jnp.maximum(acc1 * sc1 + sh1, 0.0)

    # ---- conv2 -> bn2 ----
    acc2 = conv3x3(y1, w2_ref)
    sc2, sh2 = _bn_scale_shift(acc2, g2_ref[...], b2_ref[...], cred, cspread, inv_n)

    # ---- + residual (re-read here: short live range) -> relu -> store ----
    out = jnp.maximum(acc2 * sc2 + sh2 + x_ref[...].reshape(M, WC), 0.0)
    o_ref[...] = out.reshape(B, H, WC)        # single lane-dense full store


# ----------------------------------------------------------------------------
# Parameter setup (one-time, host side)
# ----------------------------------------------------------------------------
def _pack_conv_weight_banded(w_oihw, width):
    """(Cout, Cin, 3, 3) -> (3, W*Cin, W*Cout) bf16 per-H-tap banded weights.

    For H-tap kh: row index = wi*Cin + ci (wi = input col), column index =
    wo*Cout + co (wo = output col); nonzero iff wi - wo in {-1, 0, 1}.
    Missing blocks give 'same' padding in W; 'same' padding in H is handled
    in-kernel by masking the rolled taps.
    """
    w = np.asarray(jnp.transpose(w_oihw, (2, 3, 1, 0)))    # (kh, kw, Cin, Cout)
    cin, cout = w.shape[2], w.shape[3]
    big = np.zeros((3, width, cin, width, cout), np.float32)
    for kw in range(3):
        for wo in range(width):
            wi = wo + kw - 1
            if 0 <= wi < width:
                big[:, wi, :, wo, :] = w[:, kw, :, :]
    return jnp.asarray(big.reshape(3, width * cin, width * cout),
                       dtype=jnp.bfloat16)


def _make_channel_maps(width, channels):
    eye = np.eye(channels, dtype=np.float32)
    cred = np.tile(eye, (width, 1))            # (W*C, C): per-channel reduce
    cspread = np.ascontiguousarray(cred.T)     # (C, W*C): per-channel broadcast
    return jnp.asarray(cred), jnp.asarray(cspread)


def init_residual_block_params(key, in_channels, out_channels, width):
    if in_channels != out_channels:
        # TODO(synk): downsample branch / stride != 1 not implemented.
        raise NotImplementedError("in_channels must equal out_channels")
    k1, k2 = jax.random.split(key)
    # PyTorch Conv2d default init: kaiming-uniform, fan_in = Cin * 3 * 3.
    bound1 = 1.0 / (in_channels * 9) ** 0.5
    bound2 = 1.0 / (out_channels * 9) ** 0.5
    w1_oihw = jax.random.uniform(k1, (out_channels, in_channels, 3, 3),
                                 jnp.float32, -bound1, bound1)
    w2_oihw = jax.random.uniform(k2, (out_channels, out_channels, 3, 3),
                                 jnp.float32, -bound2, bound2)
    cred, cspread = _make_channel_maps(width, out_channels)
    return dict(
        w1_oihw=w1_oihw, w2_oihw=w2_oihw,
        w1=_pack_conv_weight_banded(w1_oihw, width),   # bf16 MXU operands
        w2=_pack_conv_weight_banded(w2_oihw, width),
        g1=jnp.ones((1, out_channels), jnp.float32),
        b1=jnp.zeros((1, out_channels), jnp.float32),
        g2=jnp.ones((1, out_channels), jnp.float32),
        b2=jnp.zeros((1, out_channels), jnp.float32),
        cred=cred, cspread=cspread,
    )


# ----------------------------------------------------------------------------
# Forward wrapper
# ----------------------------------------------------------------------------
@jax.jit
def residual_block_forward(x_nchw, params):
    """Forward pass matching ResidualBlock(in_c, out_c).forward (stride=1)."""
    x = jnp.transpose(x_nchw, (0, 2, 3, 1)).astype(jnp.float32)   # NCHW -> NHWC
    B, H, W, C = x.shape
    WC = W * C
    assert params["cred"].shape[0] == WC, "params built for a different width"
    # Lane-dense layout wants W*C to be a multiple of 128 (it is 128 here);
    # other sizes stay correct but fall back to masked partial-lane stores.
    # TODO(synk): pad the channel axis to the next multiple of 128 lanes.
    x_flat = x.reshape(B, H, WC)

    out_flat = pl.pallas_call(
        residual_block_kernel,
        out_shape=jax.ShapeDtypeStruct((B, H, WC), jnp.float32),
        in_specs=[_VMEM_SPEC] * 9,
        out_specs=_VMEM_SPEC,
        compiler_params=pltpu.CompilerParams(
            # Explicit scoped-VMEM budget; fits v7x's 64 MiB with headroom.
            vmem_limit_bytes=48 * 1024 * 1024),
    )(x_flat, params["w1"], params["w2"], params["g1"], params["b1"],
      params["g2"], params["b2"], params["cred"], params["cspread"])

    return jnp.transpose(out_flat.reshape(B, H, W, C), (0, 3, 1, 2))  # -> NCHW


# ----------------------------------------------------------------------------
# Pure-JAX reference (for correctness checks)
# ----------------------------------------------------------------------------
def _reference_forward(x_nchw, params, conv_dtype=jnp.float32):
    """conv_dtype=bf16 mirrors the kernel's MXU operand precision exactly."""
    def conv(x_nhwc, w_oihw):
        w_hwio = jnp.transpose(w_oihw, (2, 3, 1, 0)).astype(conv_dtype)
        return jax.lax.conv_general_dilated(
            x_nhwc.astype(conv_dtype), w_hwio, (1, 1), "SAME",
            dimension_numbers=("NHWC", "HWIO", "NHWC"),
            preferred_element_type=jnp.float32,
            precision=jax.lax.Precision.HIGHEST)

    def bn(y, g, b):
        mu = jnp.mean(y, axis=(0, 1, 2))
        var = jnp.mean(jnp.square(y - mu), axis=(0, 1, 2))
        return (y - mu) * jax.lax.rsqrt(var + EPS) * g[0] + b[0]

    x = jnp.transpose(x_nchw, (0, 2, 3, 1)).astype(jnp.float32)
    out = jnp.maximum(bn(conv(x, params["w1_oihw"]), params["g1"], params["b1"]), 0.0)
    out = bn(conv(out, params["w2_oihw"]), params["g2"], params["b2"])
    out = jnp.maximum(out + x, 0.0)
    return jnp.transpose(out, (0, 3, 1, 2))


# ----------------------------------------------------------------------------
if __name__ == "__main__":
    key = jax.random.PRNGKey(0)
    k_x, k_p = jax.random.split(key)

    # in_channels == out_channels (no downsample); W * C = 16 * 8 = 128 lanes.
    B, C, H, W = 2, 8, 16, 16
    x = jax.random.normal(k_x, (B, C, H, W), jnp.float32)
    params = init_residual_block_params(k_p, C, C, W)

    out = jax.block_until_ready(residual_block_forward(x, params))
    assert out.shape == (B, C, H, W)

    # Structural check: reference with the SAME bf16 conv operands (tight).
    ref_bf16 = _reference_forward(x, params, conv_dtype=jnp.bfloat16)
    err_tight = float(jnp.max(jnp.abs(out - ref_bf16)))
    assert err_tight < 5e-3, f"bf16-operand reference mismatch: {err_tight}"

    # End-to-end check vs full-f32 reference (bf16 MXU operand tolerance).
    ref_f32 = _reference_forward(x, params, conv_dtype=jnp.float32)
    err_loose = float(jnp.max(jnp.abs(out - ref_f32)))
    assert err_loose < 5e-2, f"f32 reference mismatch: {err_loose}"

    print("KERNEL_OK")
</pallas_src>

<mosaic_0001>
module attributes {stable_mosaic.version = 11 : i64} {
  func.func @residual_block_kernel(%arg0: memref<2x16x128xf32, #tpu.memory_space<vmem>>, %arg1: memref<3x128x128xbf16, #tpu.memory_space<vmem>>, %arg2: memref<3x128x128xbf16, #tpu.memory_space<vmem>>, %arg3: memref<1x8xf32, #tpu.memory_space<vmem>>, %arg4: memref<1x8xf32, #tpu.memory_space<vmem>>, %arg5: memref<1x8xf32, #tpu.memory_space<vmem>>, %arg6: memref<1x8xf32, #tpu.memory_space<vmem>>, %arg7: memref<128x8xf32, #tpu.memory_space<vmem>>, %arg8: memref<8x128xf32, #tpu.memory_space<vmem>>, %arg9: memref<2x16x128xf32, #tpu.memory_space<vmem>>) attributes {dimension_semantics = [], scalar_prefetch = 0 : i64, scratch_operands = 0 : i64, tpu.core_type = #tpu.core_type<tc>} {
    %c0 = arith.constant 0 : index
    %c0_0 = arith.constant 0 : index
    %0 = vector.load %arg7[%c0, %c0_0] : memref<128x8xf32, #tpu.memory_space<vmem>>, vector<128x8xf32>
    %c0_1 = arith.constant 0 : index
    %c0_2 = arith.constant 0 : index
    %1 = vector.load %arg8[%c0_1, %c0_2] : memref<8x128xf32, #tpu.memory_space<vmem>>, vector<8x128xf32>
    %2 = tpu.iota {dimensions = array<i32: 1>} : vector<2x16x128xi32>
    %3 = vector.shape_cast %2 : vector<2x16x128xi32> to vector<32x128xi32>
    %c0_i32 = arith.constant 0 : i32
    %4 = vector.broadcast %c0_i32 : i32 to vector<32x128xi32>
    %5 = arith.cmpi eq, %3, %4 : vector<32x128xi32>
    %c15_i32 = arith.constant 15 : i32
    %6 = vector.broadcast %c15_i32 : i32 to vector<32x128xi32>
    %7 = arith.cmpi eq, %3, %6 : vector<32x128xi32>
    %c0_3 = arith.constant 0 : index
    %c0_4 = arith.constant 0 : index
    %c0_5 = arith.constant 0 : index
    %8 = vector.load %arg0[%c0_3, %c0_4, %c0_5] : memref<2x16x128xf32, #tpu.memory_space<vmem>>, vector<2x16x128xf32>
    %9 = vector.shape_cast %8 : vector<2x16x128xf32> to vector<32x128xf32>
    %c1_i32 = arith.constant 1 : i32
    %10 = tpu.dynamic_rotate %9 by %c1_i32 dim 0 : vector<32x128xf32>, i32 -> vector<32x128xf32>
    %cst = arith.constant 0.000000e+00 : f32
    %11 = vector.broadcast %cst : f32 to vector<32x128xf32>
    %12 = arith.select %5, %11, %10 : vector<32x128xi1>, vector<32x128xf32>
    %c31_i32 = arith.constant 31 : i32
    %13 = tpu.dynamic_rotate %9 by %c31_i32 dim 0 : vector<32x128xf32>, i32 -> vector<32x128xf32>
    %cst_6 = arith.constant 0.000000e+00 : f32
    %14 = vector.broadcast %cst_6 : f32 to vector<32x128xf32>
    %15 = arith.select %7, %14, %13 : vector<32x128xi1>, vector<32x128xf32>
    %16 = arith.truncf %12 : vector<32x128xf32> to vector<32x128xbf16>
    %c0_7 = arith.constant 0 : index
    %c0_8 = arith.constant 0 : index
    %c0_9 = arith.constant 0 : index
    %17 = vector.load %arg1[%c0_7, %c0_8, %c0_9] : memref<3x128x128xbf16, #tpu.memory_space<vmem>>, vector<1x128x128xbf16>
    %18 = vector.shape_cast %17 : vector<1x128x128xbf16> to vector<128x128xbf16>
    %cst_10 = arith.constant dense<0.000000e+00> : vector<32x128xf32>
    %19 = tpu.matmul %16, %18, %cst_10 {dimension_numbers = #tpu.dot_dimension_numbers<[1], [0], [0], [1], [0, 0, 1, 1], [], []>} : vector<32x128xbf16>, vector<128x128xbf16>, vector<32x128xf32> -> vector<32x128xf32>
    %20 = arith.truncf %9 : vector<32x128xf32> to vector<32x128xbf16>
    %c1 = arith.constant 1 : index
    %c0_11 = arith.constant 0 : index
    %c0_12 = arith.constant 0 : index
    %21 = vector.load %arg1[%c1, %c0_11, %c0_12] : memref<3x128x128xbf16, #tpu.memory_space<vmem>>, vector<1x128x128xbf16>
    %22 = vector.shape_cast %21 : vector<1x128x128xbf16> to vector<128x128xbf16>
    %cst_13 = arith.constant dense<0.000000e+00> : vector<32x128xf32>
    %23 = tpu.matmul %20, %22, %cst_13 {dimension_numbers = #tpu.dot_dimension_numbers<[1], [0], [0], [1], [0, 0, 1, 1], [], []>} : vector<32x128xbf16>, vector<128x128xbf16>, vector<32x128xf32> -> vector<32x128xf32>
    %24 = arith.addf %19, %23 : vector<32x128xf32>
    %25 = arith.truncf %15 : vector<32x128xf32> to vector<32x128xbf16>
    %c2 = arith.constant 2 : index
    %c0_14 = arith.constant 0 : index
    %c0_15 = arith.constant 0 : index
    %26 = vector.load %arg1[%c2, %c0_14, %c0_15] : memref<3x128x128xbf16, #tpu.memory_space<vmem>>, vector<1x128x128xbf16>
    %27 = vector.shape_cast %26 : vector<1x128x128xbf16> to vector<128x128xbf16>
    %cst_16 = arith.constant dense<0.000000e+00> : vector<32x128xf32>
    %28 = tpu.matmul %25, %27, %cst_16 {dimension_numbers = #tpu.dot_dimension_numbers<[1], [0], [0], [1], [0, 0, 1, 1], [], []>} : vector<32x128xbf16>, vector<128x128xbf16>, vector<32x128xf32> -> vector<32x128xf32>
    %29 = arith.addf %24, %28 : vector<32x128xf32>
    %c0_17 = arith.constant 0 : index
    %c0_18 = arith.constant 0 : index
    %30 = vector.load %arg3[%c0_17, %c0_18] : memref<1x8xf32, #tpu.memory_space<vmem>>, vector<1x8xf32>
    %c0_19 = arith.constant 0 : index
    %c0_20 = arith.constant 0 : index
    %31 = vector.load %arg4[%c0_19, %c0_20] : memref<1x8xf32, #tpu.memory_space<vmem>>, vector<1x8xf32>
    %cst_21 = arith.constant dense<0.000000e+00> : vector<128xf32>
    %32 = vector.multi_reduction <add>, %29, %cst_21 [0] : vector<32x128xf32> to vector<128xf32>
    %33 = vector.shape_cast %32 : vector<128xf32> to vector<1x128xf32>
    %cst_22 = arith.constant dense<0.000000e+00> : vector<1x8xf32>
    %34 = tpu.matmul %33, %0, %cst_22 {dimension_numbers = #tpu.dot_dimension_numbers<[1], [0], [0], [1], [0, 0, 1, 1], [], []>} : vector<1x128xf32>, vector<128x8xf32>, vector<1x8xf32> -> vector<1x8xf32>
    %cst_23 = arith.constant 0.001953125 : f32
    %35 = vector.broadcast %cst_23 : f32 to vector<1x8xf32>
    %36 = arith.mulf %34, %35 : vector<1x8xf32>
    %cst_24 = arith.constant dense<0.000000e+00> : vector<1x128xf32>
    %37 = tpu.matmul %36, %1, %cst_24 {dimension_numbers = #tpu.dot_dimension_numbers<[1], [0], [0], [1], [0, 0, 1, 1], [], []>} : vector<1x8xf32>, vector<8x128xf32>, vector<1x128xf32> -> vector<1x128xf32>
    %38 = vector.broadcast %37 : vector<1x128xf32> to vector<32x128xf32>
    %39 = arith.subf %29, %38 : vector<32x128xf32>
    %40 = arith.mulf %39, %39 : vector<32x128xf32>
    %cst_25 = arith.constant dense<0.000000e+00> : vector<128xf32>
    %41 = vector.multi_reduction <add>, %40, %cst_25 [0] : vector<32x128xf32> to vector<128xf32>
    %42 = vector.shape_cast %41 : vector<128xf32> to vector<1x128xf32>
    %cst_26 = arith.constant dense<0.000000e+00> : vector<1x8xf32>
    %43 = tpu.matmul %42, %0, %cst_26 {dimension_numbers = #tpu.dot_dimension_numbers<[1], [0], [0], [1], [0, 0, 1, 1], [], []>} : vector<1x128xf32>, vector<128x8xf32>, vector<1x8xf32> -> vector<1x8xf32>
    %cst_27 = arith.constant 0.001953125 : f32
    %44 = vector.broadcast %cst_27 : f32 to vector<1x8xf32>
    %45 = arith.mulf %43, %44 : vector<1x8xf32>
    %cst_28 = arith.constant 9.99999974E-6 : f32
    %46 = vector.broadcast %cst_28 : f32 to vector<1x8xf32>
    %47 = arith.addf %45, %46 : vector<1x8xf32>
    %48 = math.rsqrt %47 : vector<1x8xf32>
    %49 = arith.mulf %30, %48 : vector<1x8xf32>
    %50 = arith.mulf %36, %49 : vector<1x8xf32>
    %51 = arith.subf %31, %50 : vector<1x8xf32>
    %cst_29 = arith.constant dense<0.000000e+00> : vector<1x128xf32>
    %52 = tpu.matmul %49, %1, %cst_29 {dimension_numbers = #tpu.dot_dimension_numbers<[1], [0], [0], [1], [0, 0, 1, 1], [], []>} : vector<1x8xf32>, vector<8x128xf32>, vector<1x128xf32> -> vector<1x128xf32>
    %cst_30 = arith.constant dense<0.000000e+00> : vector<1x128xf32>
    %53 = tpu.matmul %51, %1, %cst_30 {dimension_numbers = #tpu.dot_dimension_numbers<[1], [0], [0], [1], [0, 0, 1, 1], [], []>} : vector<1x8xf32>, vector<8x128xf32>, vector<1x128xf32> -> vector<1x128xf32>
    %54 = vector.broadcast %52 : vector<1x128xf32> to vector<32x128xf32>
    %55 = arith.mulf %29, %54 : vector<32x128xf32>
    %56 = vector.broadcast %53 : vector<1x128xf32> to vector<32x128xf32>
    %57 = arith.addf %55, %56 : vector<32x128xf32>
    %cst_31 = arith.constant 0.000000e+00 : f32
    %58 = vector.broadcast %cst_31 : f32 to vector<32x128xf32>
    %59 = arith.maximumf %57, %58 : vector<32x128xf32>
    %c1_i32_32 = arith.constant 1 : i32
    %60 = tpu.dynamic_rotate %59 by %c1_i32_32 dim 0 : vector<32x128xf32>, i32 -> vector<32x128xf32>
    %cst_33 = arith.constant 0.000000e+00 : f32
    %61 = vector.broadcast %cst_33 : f32 to vector<32x128xf32>
    %62 = arith.select %5, %61, %60 : vector<32x128xi1>, vector<32x128xf32>
    %c31_i32_34 = arith.constant 31 : i32
    %63 = tpu.dynamic_rotate %59 by %c31_i32_34 dim 0 : vector<32x128xf32>, i32 -> vector<32x128xf32>
    %cst_35 = arith.constant 0.000000e+00 : f32
    %64 = vector.broadcast %cst_35 : f32 to vector<32x128xf32>
    %65 = arith.select %7, %64, %63 : vector<32x128xi1>, vector<32x128xf32>
    %66 = arith.truncf %62 : vector<32x128xf32> to vector<32x128xbf16>
    %c0_36 = arith.constant 0 : index
    %c0_37 = arith.constant 0 : index
    %c0_38 = arith.constant 0 : index
    %67 = vector.load %arg2[%c0_36, %c0_37, %c0_38] : memref<3x128x128xbf16, #tpu.memory_space<vmem>>, vector<1x128x128xbf16>
    %68 = vector.shape_cast %67 : vector<1x128x128xbf16> to vector<128x128xbf16>
    %cst_39 = arith.constant dense<0.000000e+00> : vector<32x128xf32>
    %69 = tpu.matmul %66, %68, %cst_39 {dimension_numbers = #tpu.dot_dimension_numbers<[1], [0], [0], [1], [0, 0, 1, 1], [], []>} : vector<32x128xbf16>, vector<128x128xbf16>, vector<32x128xf32> -> vector<32x128xf32>
    %70 = arith.truncf %59 : vector<32x128xf32> to vector<32x128xbf16>
    %c1_40 = arith.constant 1 : index
    %c0_41 = arith.constant 0 : index
    %c0_42 = arith.constant 0 : index
    %71 = vector.load %arg2[%c1_40, %c0_41, %c0_42] : memref<3x128x128xbf16, #tpu.memory_space<vmem>>, vector<1x128x128xbf16>
    %72 = vector.shape_cast %71 : vector<1x128x128xbf16> to vector<128x128xbf16>
    %cst_43 = arith.constant dense<0.000000e+00> : vector<32x128xf32>
    %73 = tpu.matmul %70, %72, %cst_43 {dimension_numbers = #tpu.dot_dimension_numbers<[1], [0], [0], [1], [0, 0, 1, 1], [], []>} : vector<32x128xbf16>, vector<128x128xbf16>, vector<32x128xf32> -> vector<32x128xf32>
    %74 = arith.addf %69, %73 : vector<32x128xf32>
    %75 = arith.truncf %65 : vector<32x128xf32> to vector<32x128xbf16>
    %c2_44 = arith.constant 2 : index
    %c0_45 = arith.constant 0 : index
    %c0_46 = arith.constant 0 : index
    %76 = vector.load %arg2[%c2_44, %c0_45, %c0_46] : memref<3x128x128xbf16, #tpu.memory_space<vmem>>, vector<1x128x128xbf16>
    %77 = vector.shape_cast %76 : vector<1x128x128xbf16> to vector<128x128xbf16>
    %cst_47 = arith.constant dense<0.000000e+00> : vector<32x128xf32>
    %78 = tpu.matmul %75, %77, %cst_47 {dimension_numbers = #tpu.dot_dimension_numbers<[1], [0], [0], [1], [0, 0, 1, 1], [], []>} : vector<32x128xbf16>, vector<128x128xbf16>, vector<32x128xf32> -> vector<32x128xf32>
    %79 = arith.addf %74, %78 : vector<32x128xf32>
    %c0_48 = arith.constant 0 : index
    %c0_49 = arith.constant 0 : index
    %80 = vector.load %arg5[%c0_48, %c0_49] : memref<1x8xf32, #tpu.memory_space<vmem>>, vector<1x8xf32>
    %c0_50 = arith.constant 0 : index
    %c0_51 = arith.constant 0 : index
    %81 = vector.load %arg6[%c0_50, %c0_51] : memref<1x8xf32, #tpu.memory_space<vmem>>, vector<1x8xf32>
    %cst_52 = arith.constant dense<0.000000e+00> : vector<128xf32>
    %82 = vector.multi_reduction <add>, %79, %cst_52 [0] : vector<32x128xf32> to vector<128xf32>
    %83 = vector.shape_cast %82 : vector<128xf32> to vector<1x128xf32>
    %cst_53 = arith.constant dense<0.000000e+00> : vector<1x8xf32>
    %84 = tpu.matmul %83, %0, %cst_53 {dimension_numbers = #tpu.dot_dimension_numbers<[1], [0], [0], [1], [0, 0, 1, 1], [], []>} : vector<1x128xf32>, vector<128x8xf32>, vector<1x8xf32> -> vector<1x8xf32>
    %cst_54 = arith.constant 0.001953125 : f32
    %85 = vector.broadcast %cst_54 : f32 to vector<1x8xf32>
    %86 = arith.mulf %84, %85 : vector<1x8xf32>
    %cst_55 = arith.constant dense<0.000000e+00> : vector<1x128xf32>
    %87 = tpu.matmul %86, %1, %cst_55 {dimension_numbers = #tpu.dot_dimension_numbers<[1], [0], [0], [1], [0, 0, 1, 1], [], []>} : vector<1x8xf32>, vector<8x128xf32>, vector<1x128xf32> -> vector<1x128xf32>
    %88 = vector.broadcast %87 : vector<1x128xf32> to vector<32x128xf32>
    %89 = arith.subf %79, %88 : vector<32x128xf32>
    %90 = arith.mulf %89, %89 : vector<32x128xf32>
    %cst_56 = arith.constant dense<0.000000e+00> : vector<128xf32>
    %91 = vector.multi_reduction <add>, %90, %cst_56 [0] : vector<32x128xf32> to vector<128xf32>
    %92 = vector.shape_cast %91 : vector<128xf32> to vector<1x128xf32>
    %cst_57 = arith.constant dense<0.000000e+00> : vector<1x8xf32>
    %93 = tpu.matmul %92, %0, %cst_57 {dimension_numbers = #tpu.dot_dimension_numbers<[1], [0], [0], [1], [0, 0, 1, 1], [], []>} : vector<1x128xf32>, vector<128x8xf32>, vector<1x8xf32> -> vector<1x8xf32>
    %cst_58 = arith.constant 0.001953125 : f32
    %94 = vector.broadcast %cst_58 : f32 to vector<1x8xf32>
    %95 = arith.mulf %93, %94 : vector<1x8xf32>
    %cst_59 = arith.constant 9.99999974E-6 : f32
    %96 = vector.broadcast %cst_59 : f32 to vector<1x8xf32>
    %97 = arith.addf %95, %96 : vector<1x8xf32>
    %98 = math.rsqrt %97 : vector<1x8xf32>
    %99 = arith.mulf %80, %98 : vector<1x8xf32>
    %100 = arith.mulf %86, %99 : vector<1x8xf32>
    %101 = arith.subf %81, %100 : vector<1x8xf32>
    %cst_60 = arith.constant dense<0.000000e+00> : vector<1x128xf32>
    %102 = tpu.matmul %99, %1, %cst_60 {dimension_numbers = #tpu.dot_dimension_numbers<[1], [0], [0], [1], [0, 0, 1, 1], [], []>} : vector<1x8xf32>, vector<8x128xf32>, vector<1x128xf32> -> vector<1x128xf32>
    %cst_61 = arith.constant dense<0.000000e+00> : vector<1x128xf32>
    %103 = tpu.matmul %101, %1, %cst_61 {dimension_numbers = #tpu.dot_dimension_numbers<[1], [0], [0], [1], [0, 0, 1, 1], [], []>} : vector<1x8xf32>, vector<8x128xf32>, vector<1x128xf32> -> vector<1x128xf32>
    %104 = vector.broadcast %102 : vector<1x128xf32> to vector<32x128xf32>
    %105 = arith.mulf %79, %104 : vector<32x128xf32>
    %106 = vector.broadcast %103 : vector<1x128xf32> to vector<32x128xf32>
    %107 = arith.addf %105, %106 : vector<32x128xf32>
    %c0_62 = arith.constant 0 : index
    %c0_63 = arith.constant 0 : index
    %c0_64 = arith.constant 0 : index
    %108 = vector.load %arg0[%c0_62, %c0_63, %c0_64] : memref<2x16x128xf32, #tpu.memory_space<vmem>>, vector<2x16x128xf32>
    %109 = vector.shape_cast %108 : vector<2x16x128xf32> to vector<32x128xf32>
    %110 = arith.addf %107, %109 : vector<32x128xf32>
    %cst_65 = arith.constant 0.000000e+00 : f32
    %111 = vector.broadcast %cst_65 : f32 to vector<32x128xf32>
    %112 = arith.maximumf %110, %111 : vector<32x128xf32>
    %113 = vector.shape_cast %112 : vector<32x128xf32> to vector<2x16x128xf32>
    %c0_66 = arith.constant 0 : index
    %c0_67 = arith.constant 0 : index
    %c0_68 = arith.constant 0 : index
    %114 = vector.load %arg9[%c0_66, %c0_67, %c0_68] : memref<2x16x128xf32, #tpu.memory_space<vmem>>, vector<2x16x128xf32>
    tpu.vector_store %arg9[%c0_66, %c0_67, %c0_68], %113 {strides = array<i32>} : memref<2x16x128xf32, #tpu.memory_space<vmem>>, vector<2x16x128xf32>,
    return
  }
}

</mosaic_0001>

<bundles_post_ra>
// kernel: residual_block_forward.1
= control target key start
LH: loop header
LB: loop body
LE: loop exit
PB: predicated region body
PF: predicated region fallthrough
CT: control target
= control target key end

     0   :  { %v50_v8 = vlaneseq  ;;  %vm2303_vm2 = vmmov 1   ;;  %v2304_v55 = vmov 0.0   ;;  %vm2305_vm7 = vmmov 0   ;;  %s2941_s1 = inlined_call_operand.vmem [shape: bf16[3,128,128], index: 1, kind: input, shape index: {}]   ;;  %s2942_s0 = inlined_call_operand.vmem [shape: f32[2,16,128], index: 0, kind: input, shape index: {}]   ;;  %s2943_s7 = inlined_call_operand.vmem [shape: f32[128,8], index: 7, kind: input, shape index: {}]   ;;  %s2944_s8 = inlined_call_operand.vmem [shape: f32[8,128], index: 8, kind: input, shape index: {}]   ;;  %s2945_s2 = inlined_call_operand.vmem [shape: bf16[3,128,128], index: 2, kind: input, shape index: {}]   ;;  %s2946_s3 = inlined_call_operand.vmem [shape: f32[1,8], index: 3, kind: input, shape index: {}]   ;;  %s2947_s4 = inlined_call_operand.vmem [shape: f32[1,8], index: 4, kind: input, shape index: {}]   ;;  %s2948_s5 = inlined_call_operand.vmem [shape: f32[1,8], index: 5, kind: input, shape index: {}]   ;;  %s2949_s6 = inlined_call_operand.vmem [shape: f32[1,8], index: 6, kind: input, shape index: {}]   ;;  %s2950_s9 = inlined_call_operand.vmem [shape: f32[2,16,128], index: 9, kind: output, shape index: {}]  }
   0x1   :  { %v2247_v0 = vld [vmem:[%s2941_s1 + $0x78] sm:$0xff]   ;;  %v2249_v2 = vld [vmem:[%s2941_s1 + $0x70] sm:$0xff]   ;;  %v2251_v4 = vld [vmem:[%s2941_s1 + $0x68] sm:$0xff]   ;;  %vm520_vm8 = vcmask 64512  }
   0x2   :  { %v2248_v1 = vld [vmem:[%s2941_s1 + $0x38] sm:$0xff]   ;;  %1954 = vmatprep.subr.bf16.mxu0 %v2247_v0  ;;  %v2250_v3 = vld [vmem:[%s2941_s1 + $0x30] sm:$0xff]   ;;  %v2252_v5 = vld [vmem:[%s2941_s1 + $0x28] sm:$0xff]   ;;  %v2386_v11 = vshrl.u32 %v50_v8, 7 }
   0x3   :  { %1974 = vmatprep.subr.bf16.mxu1 %v2248_v1  ;;  %1955 = vmatpush3.bf16.msra.mxu0 %v2247_v0  ;;  %v2253_v6 = vld [vmem:[%s2941_s1 + $0x60] sm:$0xff]   ;;  %v2255_v9 = vld [vmem:[%s2941_s1 + $0x58] sm:$0xff]   ;;  %v2257_v12 = vld [vmem:[%s2941_s1 + $0x50] sm:$0xff]  }
   0x4   :  { %1975 = vmatpush3.bf16.msra.mxu1 %v2248_v1  ;;  %1956 = vmatprep.subr.bf16.mxu0 %v2249_v2  ;;  %v2254_v7 = vld [vmem:[%s2941_s1 + $0x20] sm:$0xff]   ;;  %v2256_v10 = vld [vmem:[%s2941_s1 + $0x18] sm:$0xff]   ;;  %v58_v14 = vld [vmem:[%s2942_s0 + $0x8] sm:$0xff]  ;;  %vm65_vm0 = vcmp.lt.s32.totalorder %v2386_v11, 1  ;;  %vm1812_vm1 = vcmp.ne.s32.totalorder %v2386_v11, 0  ;;  %v52_v34 = vadd.s32 8, %v2386_v11 }
   0x5   :  { %1976 = vmatprep.subr.bf16.mxu1 %v2250_v3  ;;  %v2394_v13 = vld [vmem:[%s2942_s0] sm:$0xff]  ;;  %v2402_v15 = vld [vmem:[%s2942_s0 + $0x18] sm:$0xff]  ;;  %v2258_v16 = vld [vmem:[%s2941_s1 + $0x10] sm:$0xff]   ;;  %v62_v20 = vrot.slane %v58_v14, 7  ;;  %v75_v32 = vrot.slane %v58_v14, 1  ;;  %vm78_vm4 = vcmp.lt.s32.totalorder %v2386_v11, 7 }
   0x6   :  { %v105_v17 = vpack.c.bf16 %v58_v14, %v2394_v13  ;;  %v61_v18 = vrot.slane %v2394_v13, 7  ;;  %v2259_v19 = vld [vmem:[%s2941_s1 + $0x48] sm:$0xff]   ;;  %v64_v21 = vrot.slane %v2402_v15, 7  ;;  %vm2423_vm3 = vmpackc.low %vm2303_vm2, %vm1812_vm1  ;;  %v59_v27 = vld [vmem:[%s2942_s0 + $0x10] sm:$0xff]  ;;  %v74_v30 = vrot.slane %v2394_v13, 1 }
   0x7   :  { %1957 = vmatpush3.bf16.msra.mxu0 %v2249_v2  ;;  %v2260_v22 = vld [vmem:[%s2941_s1 + $0x8] sm:$0xff]   ;;  %v2261_v28 = vld [vmem:[%s2941_s1 + $0x40] sm:$0xff]   ;;  %v63_v31 = vrot.slane %v59_v27, 7  ;;  %v76_v33 = vrot.slane %v59_v27, 1  ;;  %v2263_v37 = vld [vmem:[%s2941_s1 + $0xb8] sm:$0xff]   ;;  %v106_v40 = vpack.c.bf16 %v2402_v15, %v59_v27  ;;  %vm1813_vm5 = vcmp.ne.s32.totalorder %v52_v34, 15 }
   0x8   :  { %1977 = vmatpush3.bf16.msra.mxu1 %v2250_v3  ;;  %1958 = vmatprep.subr.bf16.mxu0 %v2251_v4  ;;  %v68_v23 = vsel %vm65_vm0, %v61_v18, %v62_v20  ;;  %v69_v24 = vsel %vm65_vm0, %v64_v21, %v61_v18  ;;  %v2262_v29 = vld [vmem:[%s2941_s1] sm:$0xff]   ;;  %v81_v39 = vsel %vm78_vm4, %v74_v30, %v75_v32  ;;  %v2264_v42 = vld [vmem:[%s2941_s1 + $0xb0] sm:$0xff]   ;;  %vm2457_vm6 = vmpackc.low %vm1813_vm5, %vm2303_vm2  ;;  %v77_v50 = vrot.slane %v2402_v15, 1 }
   0x9   :  { %1978 = vmatprep.subr.bf16.mxu1 %v2252_v5  ;;  %1970 = vmatprep.mubr.bf16.mxu0 %v105_v17  ;;  %v1696_v26 = vpack.c.bf16 %v68_v23, %v69_v24  ;;  %v66_v35 = vsel %vm65_vm0, %v63_v31, %v64_v21  ;;  %v67_v36 = vsel %vm65_vm0, %v62_v20, %v63_v31  ;;  %v2265_v45 = vld [vmem:[%s2941_s1 + $0xa8] sm:$0xff]   ;;  %v2266_v46 = vld [vmem:[%s2941_s1 + $0xa0] sm:$0xff]   ;;  %v2267_v47 = vld [vmem:[%s2941_s1 + $0x98] sm:$0xff]  }
   0xa   :  { %v80_v38 = vsel %vm78_vm4, %v75_v32, %v76_v33  ;;  %v1700_v41 = vpack.c.bf16 %v66_v35, %v67_v36  ;;  %v2268_v48 = vld [vmem:[%s2941_s1 + $0x90] sm:$0xff]   ;;  %v2269_v49 = vld [vmem:[%s2941_s1 + $0x88] sm:$0xff]   ;;  %v2270_v51 = vld [vmem:[%s2941_s1 + $0x80] sm:$0xff]   ;;  %v79_v52 = vsel %vm78_vm4, %v76_v33, %v77_v50  ;;  %v82_v53 = vsel %vm78_vm4, %v77_v50, %v74_v30 }
   0xb   :  { %1959 = vmatpush3.bf16.msra.mxu0 %v2251_v4  ;;  %1990 = vmatprep.mubr.msk.bf16.mxu1 %vm2423_vm3, %v1696_v26  ;;  %v1728_v43 = vpack.c.bf16 %v80_v38, %v81_v39  ;;  %v1732_v54 = vpack.c.bf16 %v82_v53, %v79_v52  ;;  %v2494_v56 = vld [vmem:[%s2943_s7 + $0x78] sm:$0xff]  ;;  %v2499_v57 = vld [vmem:[%s2943_s7 + $0x70] sm:$0xff]  ;;  %v2513_v58 = vld [vmem:[%s2943_s7 + $0x68] sm:$0xff] }
   0xc   :  { %1979 = vmatpush3.bf16.msra.mxu1 %v2252_v5  ;;  %1960 = vmatprep.subr.bf16.mxu0 %v2253_v6  ;;  %v2521_v59 = vld [vmem:[%s2943_s7 + $0x60] sm:$0xff]  ;;  %v2530_v60 = vld [vmem:[%s2943_s7 + $0x58] sm:$0xff]  ;;  %v2539_v61 = vld [vmem:[%s2943_s7 + $0x50] sm:$0xff] }
   0xd   :  { %1980 = vmatprep.subr.bf16.mxu1 %v2254_v7  ;;  %v2548_v62 = vld [vmem:[%s2943_s7 + $0x48] sm:$0xff]  ;;  %v2557_v63 = vld [vmem:[%s2943_s7 + $0x40] sm:$0xff]  ;;  %v2566_v0 = vld [vmem:[%s2943_s7 + $0x38] sm:$0xff] }
   0xe   :  { %v2575_v1 = vld [vmem:[%s2943_s7 + $0x30] sm:$0xff]  ;;  %v2584_v2 = vld [vmem:[%s2943_s7 + $0x28] sm:$0xff]  ;;  %v2591_v3 = vld [vmem:[%s2943_s7 + $0x20] sm:$0xff] }
   0xf   :  { %1961 = vmatpush3.bf16.msra.mxu0 %v2253_v6  ;;  %v2598_v4 = vld [vmem:[%s2943_s7 + $0x18] sm:$0xff]  ;;  %v2608_v5 = vld [vmem:[%s2943_s7 + $0x10] sm:$0xff]  ;;  %v2617_v6 = vld [vmem:[%s2943_s7 + $0x8] sm:$0xff] }
  0x10   :  { %1981 = vmatpush3.bf16.msra.mxu1 %v2254_v7  ;;  %1962 = vmatprep.subr.bf16.mxu0 %v2255_v9  ;;  %v2626_v7 = vld [vmem:[%s2943_s7] sm:$0xff]  ;;  %v2291_v25 = vld [vmem:[%s2945_s2 + $0x98] sm:$0xff]  }
  0x11   :  { %1982 = vmatprep.subr.bf16.mxu1 %v2256_v10  ;;  %v2654_v39 = vld [vmem:[%s2944_s8] sm:$0xff] }
  0x13   :  { %1963 = vmatpush3.bf16.msra.mxu0 %v2255_v9 }
  0x14   :  { %1983 = vmatpush3.bf16.msra.mxu1 %v2256_v10  ;;  %1964 = vmatprep.subr.bf16.mxu0 %v2257_v12 }
  0x15   :  { %1984 = vmatprep.subr.bf16.mxu1 %v2258_v16 }
  0x17   :  { %1965 = vmatpush3.bf16.msra.mxu0 %v2257_v12 }
  0x18   :  { %1985 = vmatpush3.bf16.msra.mxu1 %v2258_v16  ;;  %1966 = vmatprep.subr.bf16.mxu0 %v2259_v19 }
  0x19   :  { %1986 = vmatprep.subr.bf16.mxu1 %v2260_v22 }
  0x1b   :  { %1967 = vmatpush3.bf16.msra.mxu0 %v2259_v19 }
  0x1c   :  { %1987 = vmatpush3.bf16.msra.mxu1 %v2260_v22  ;;  %1968 = vmatprep.subr.bf16.mxu0 %v2261_v28 }
  0x1d   :  { %1988 = vmatprep.subr.bf16.mxu1 %v2262_v29 }
  0x1f   :  { %1969 = vmatpush3.bf16.msra.mxu0 %v2261_v28 }
  0x20   :  { %1989 = vmatpush3.bf16.msra.mxu1 %v2262_v29  ;;  %1994 = vmatprep.subr.bf16.mxu0 %v2263_v37 }
  0x21   :  { %2014 = vmatprep.subr.mxu1 %v2304_v55 }
  0x22   :  { %1971 = vmatmul.mubr.bf16.vlgmr.msra.gmra.mxu0 %v106_v40 }
  0x23   :  { %1991 = vmatmul.mubr.msk.bf16.vlgmr.msra.gmra.mxu1 %vm2423_vm3, %v1700_v41  ;;  %1995 = vmatpush3.bf16.msra.mxu0 %v2263_v37 }
  0x24   :  { %1996 = vmatprep.subr.bf16.mxu0 %v2264_v42  ;;  %2010 = vmatprep.mubr.msk.bf16.mxu0 %vm2457_vm6, %v1728_v43  ;;  %v2666_v43 = vsub.s32 0, %v2386_v11 }
  0x25   :  { %2015 = vmatpush3.msra.mxu1 %v2494_v56  ;;  %2046 = vmatprep.mubr.msk.f32.mxu1 %vm2305_vm7, %v2304_v55 }
  0x26   :  { %2016 = vmatprep.subr.mxu1 %v2304_v55 }
  0x27   :  { %1997 = vmatpush3.bf16.msra.mxu0 %v2264_v42  ;;  %2017 = vmatpush3.msra.mxu1 %v2499_v57 }
  0x28   :  { %1998 = vmatprep.subr.bf16.mxu0 %v2265_v45  ;;  %2018 = vmatprep.subr.mxu1 %v2304_v55 }
  0x29   :  { %2019 = vmatpush3.msra.mxu1 %v2513_v58 }
  0x2a   :  { %2020 = vmatprep.subr.mxu1 %v2304_v55 }
  0x2b   :  { %1999 = vmatpush3.bf16.msra.mxu0 %v2265_v45  ;;  %2021 = vmatpush3.msra.mxu1 %v2521_v59 }
  0x2c   :  { %2000 = vmatprep.subr.bf16.mxu0 %v2266_v46  ;;  %2022 = vmatprep.subr.mxu1 %v2304_v55 }
  0x2d   :  { %2023 = vmatpush3.msra.mxu1 %v2530_v60 }
  0x2e   :  { %2024 = vmatprep.subr.mxu1 %v2304_v55 }
  0x2f   :  { %2001 = vmatpush3.bf16.msra.mxu0 %v2266_v46  ;;  %2025 = vmatpush3.msra.mxu1 %v2539_v61 }
  0x30   :  { %2002 = vmatprep.subr.bf16.mxu0 %v2267_v47  ;;  %2026 = vmatprep.subr.mxu1 %v2304_v55 }
  0x31   :  { %2027 = vmatpush3.msra.mxu1 %v2548_v62 }
  0x32   :  { %2028 = vmatprep.subr.mxu1 %v2304_v55 }
  0x33   :  { %2003 = vmatpush3.bf16.msra.mxu0 %v2267_v47  ;;  %2029 = vmatpush3.msra.mxu1 %v2557_v63 }
  0x34   :  { %2004 = vmatprep.subr.bf16.mxu0 %v2268_v48  ;;  %2030 = vmatprep.subr.mxu1 %v2304_v55 }
  0x35   :  { %2031 = vmatpush3.msra.mxu1 %v2566_v0 }
  0x36   :  { %2032 = vmatprep.subr.mxu1 %v2304_v55 }
  0x37   :  { %2005 = vmatpush3.bf16.msra.mxu0 %v2268_v48  ;;  %2033 = vmatpush3.msra.mxu1 %v2575_v1 }
  0x38   :  { %2006 = vmatprep.subr.bf16.mxu0 %v2269_v49  ;;  %2034 = vmatprep.subr.mxu1 %v2304_v55 }
  0x39   :  { %2035 = vmatpush3.msra.mxu1 %v2584_v2 }
  0x3a   :  { %2036 = vmatprep.subr.mxu1 %v2304_v55 }
  0x3b   :  { %2007 = vmatpush3.bf16.msra.mxu0 %v2269_v49  ;;  %2037 = vmatpush3.msra.mxu1 %v2591_v3 }
  0x3c   :  { %2008 = vmatprep.subr.bf16.mxu0 %v2270_v51  ;;  %2038 = vmatprep.subr.mxu1 %v2304_v55 }
  0x3d   :  { %2039 = vmatpush3.msra.mxu1 %v2598_v4 }
  0x3e   :  { %2040 = vmatprep.subr.mxu1 %v2304_v55 }
  0x3f   :  { %2009 = vmatpush3.bf16.msra.mxu0 %v2270_v51  ;;  %2041 = vmatpush3.msra.mxu1 %v2608_v5 }
  0x40   :  { %2054 = vmatprep.subr.mxu0 %v2304_v55  ;;  %2042 = vmatprep.subr.mxu1 %v2304_v55 }
  0x41   :  { %2043 = vmatpush3.msra.mxu1 %v2617_v6 }
  0x42   :  { %2011 = vmatmul.mubr.msk.bf16.vlgmr.msra.gmra.mxu0 %vm2457_vm6, %v1732_v54  ;;  %2044 = vmatprep.subr.mxu1 %v2304_v55 }
  0x43   :  { %2055 = vmatpush3.msra.mxu0 %v2494_v56  ;;  %2045 = vmatpush3.msra.mxu1 %v2626_v7 }
  0x44   :  { %2056 = vmatprep.subr.mxu0 %v2304_v55  ;;  %2049 = vmatprep.subr.mxu1 %v2304_v55 }
  0x45   :  { %2057 = vmatpush3.msra.mxu0 %v2499_v57  ;;  %2086 = vmatprep.mubr.msk.f32.mxu0 %vm2305_vm7, %v2304_v55 }
  0x46   :  { %2058 = vmatprep.subr.mxu0 %v2304_v55 }
  0x47   :  { %2059 = vmatpush3.msra.mxu0 %v2513_v58 }
  0x48   :  { %2060 = vmatprep.subr.mxu0 %v2304_v55 }
  0x49   :  { %2061 = vmatpush3.msra.mxu0 %v2521_v59 }
  0x4a   :  { %2062 = vmatprep.subr.mxu0 %v2304_v55 }
  0x4b   :  { %2063 = vmatpush3.msra.mxu0 %v2530_v60 }
  0x4c   :  { %2064 = vmatprep.subr.mxu0 %v2304_v55 }
  0x4d   :  { %2065 = vmatpush3.msra.mxu0 %v2539_v61 }
  0x4e   :  { %2066 = vmatprep.subr.mxu0 %v2304_v55 }
  0x4f   :  { %2067 = vmatpush3.msra.mxu0 %v2548_v62 }
  0x50   :  { %2068 = vmatprep.subr.mxu0 %v2304_v55 }
  0x51   :  { %2069 = vmatpush3.msra.mxu0 %v2557_v63 }
  0x52   :  { %2070 = vmatprep.subr.mxu0 %v2304_v55 }
  0x53   :  { %2071 = vmatpush3.msra.mxu0 %v2566_v0 }
  0x54   :  { %2072 = vmatprep.subr.mxu0 %v2304_v55 }
  0x55   :  { %2073 = vmatpush3.msra.mxu0 %v2575_v1 }
  0x56   :  { %2074 = vmatprep.subr.mxu0 %v2304_v55 }
  0x57   :  { %2075 = vmatpush3.msra.mxu0 %v2584_v2 }
  0x58   :  { %2076 = vmatprep.subr.mxu0 %v2304_v55 }
  0x59   :  { %2077 = vmatpush3.msra.mxu0 %v2591_v3 }
  0x5a   :  { %2078 = vmatprep.subr.mxu0 %v2304_v55 }
  0x5b   :  { %2079 = vmatpush3.msra.mxu0 %v2598_v4 }
  0x5c   :  { %2080 = vmatprep.subr.mxu0 %v2304_v55 }
  0x5d   :  { %2081 = vmatpush3.msra.mxu0 %v2608_v5 }
  0x5e   :  { %2082 = vmatprep.subr.mxu0 %v2304_v55 }
  0x5f   :  { %2083 = vmatpush3.msra.mxu0 %v2617_v6 }
  0x60   :  { %2084 = vmatprep.subr.mxu0 %v2304_v55 }
  0x61   :  { %2085 = vmatpush3.msra.mxu0 %v2626_v7 }
  0xe2   :  { %v1972_v8 = vpop.f32.mrf.mxu0 }
  0xe3   :  { %v1992_v9 = vpop.f32.mrf.mxu1 }
  0xe4   :  { %v206_v10 = vpop.f32.mrf.mxu0  ;;  %v312_v23 = vadd.f32 %v1992_v9, %v1972_v8 }
  0xe5   :  { %v303_v12 = vpop.f32.mrf.mxu1 }
  0xe6   :  { %v1973_v13 = vpop.f32.mrf.mxu0  ;;  %v304_v20 = vadd.f32 %v303_v12, %v206_v10 }
  0xe7   :  { %v1993_v14 = vpop.f32.mrf.mxu1 }
  0xe8   :  { %v209_v15 = vpop.f32.mrf.mxu0  ;;  %v315_v27 = vadd.f32 %v1993_v14, %v1973_v13 }
  0xe9   :  { %v306_v17 = vpop.f32.mrf.mxu1 }
  0xea   :  { %v307_v21 = vadd.f32 %v306_v17, %v209_v15 }
 0x102   :  { %v2012_v16 = vpop.f32.mrf.mxu0 }
 0x103   :  { %v2643_v28 = vadd.f32 %v2012_v16, %v312_v23 }
 0x104   :  { %v419_v18 = vpop.f32.mrf.mxu0 }
 0x105   :  { %v2639_v24 = vadd.f32 %v419_v18, %v304_v20  ;;  %v2275_v20 = vld [vmem:[%s2945_s2 + $0x30] sm:$0xff]  }
 0x106   :  { %v2013_v19 = vpop.f32.mrf.mxu0 }
 0x107   :  { %v2647_v30 = vadd.f32 %v2013_v19, %v315_v27  ;;  %v2273_v19 = vld [vmem:[%s2945_s2 + $0x38] sm:$0xff]  }
 0x108   :  { %v422_v22 = vpop.f32.mrf.mxu0  ;;  %2119 = vmatprep.subr.bf16.mxu0 %v2273_v19 }
 0x109   :  { %v2641_v26 = vadd.f32 %v422_v22, %v307_v21  ;;  %v2277_v21 = vld [vmem:[%s2945_s2 + $0x28] sm:$0xff]   ;;  %v2279_v22 = vld [vmem:[%s2945_s2 + $0x20] sm:$0xff]  }
 0x10b   :  { %v440_v29 = vadd.f32 %v2641_v26, %v2639_v24 }
 0x10d   :  { %v441_v31 = vadd.f32 %v440_v29, %v2643_v28 }
 0x10f   :  { %v442_v32 = vadd.f32 %v441_v31, %v2647_v30 }
 0x111   :  { %v443_v33 = vrot.slane %v442_v32, 4 }
 0x113   :  { %v444_v34 = vadd.f32 %v443_v33, %v442_v32  ;;  %v438_v32 = vld [vmem:[%s2946_s3] sm:$0x1] }
 0x115   :  { %v445_v35 = vrot.slane %v444_v34, 2 }
 0x117   :  { %v446_v36 = vadd.f32 %v445_v35, %v444_v34  ;;  %v2271_v35 = vld [vmem:[%s2945_s2 + $0x78] sm:$0xff]  }
 0x119   :  { %v447_v37 = vrot.slane %v446_v36, 1 }
 0x11b   :  { %v448_v38 = vadd.f32 %v447_v37, %v446_v36  ;;  %v439_v36 = vld [vmem:[%s2947_s4] sm:$0x1] }
 0x11d   :  { %2047 = vmatmul.mubr.f32.vlgmr.msra.gmra.mxu1 %v448_v38 }
 0x11e   :  { %2050 = vmatpush3.msra.mxu1 %v2654_v39  ;;  %2051 = vmatprep.mubr.msk.f32.mxu1 %vm2305_vm7, %v2304_v55 }
 0x11f   :  { %2089 = vmatprep.subr.mxu1 %v2304_v55 }
 0x1dd   :  { %v515_v40 = vpop.f32.mrf.mxu1 }
 0x1de   :  { %v519_v41 = vmul.f32 0.001953125, %v515_v40  ;;  %v2272_v40 = vld [vmem:[%s2945_s2 + $0x70] sm:$0xff]  }
 0x1df   :  { %v2048_v42 = vpop.f32.mrf.mxu1 }
 0x1e0   :  { %2052 = vmatmul.mubr.msk.f32.vlgmr.msra.gmra.mxu1 %vm520_vm8, %v519_v41  ;;  %v2274_v42 = vld [vmem:[%s2945_s2 + $0x68] sm:$0xff]  }
 0x1e1   :  { %2090 = vmatpush3.msra.mxu1 %v2654_v39  ;;  %2091 = vmatprep.mubr.msk.f32.mxu1 %vm2305_vm7, %v2304_v55 }
 0x1e2   :  { %2094 = vmatprep.subr.mxu1 %v2304_v55 }
 0x2a0   :  { %v590_v45 = vpop.f32.mrf.mxu1 }
 0x2a1   :  { %v597_v46 = vrot.slane %v590_v45, %v2666_v43  ;;  %v2278_v45 = vld [vmem:[%s2945_s2 + $0x58] sm:$0xff]  }
 0x2a2   :  { %v2053_v47 = vpop.f32.mrf.mxu1 }
 0x2a3   :  { %v598_v48 = vsub.f32 %v2639_v24, %v597_v46  ;;  %v599_v49 = vsub.f32 %v2641_v26, %v597_v46  ;;  %v600_v50 = vsub.f32 %v2643_v28, %v597_v46  ;;  %v601_v51 = vsub.f32 %v2647_v30, %v597_v46  ;;  %v2280_v46 = vld [vmem:[%s2945_s2 + $0x50] sm:$0xff]   ;;  %v2281_v47 = vld [vmem:[%s2945_s2 + $0x18] sm:$0xff]  }
 0x2a5   :  { %v602_v52 = vmul.f32 %v598_v48, %v598_v48  ;;  %v603_v53 = vmul.f32 %v599_v49, %v599_v49  ;;  %v604_v54 = vmul.f32 %v600_v50, %v600_v50  ;;  %v605_v9 = vmul.f32 %v601_v51, %v601_v51  ;;  %v2282_v48 = vld [vmem:[%s2945_s2 + $0x48] sm:$0xff]   ;;  %v2283_v49 = vld [vmem:[%s2945_s2 + $0x10] sm:$0xff]   ;;  %v2284_v50 = vld [vmem:[%s2945_s2 + $0x40] sm:$0xff]  }
 0x2a6   :  { %v2285_v51 = vld [vmem:[%s2945_s2 + $0x8] sm:$0xff]  }
 0x2a7   :  { %v606_v8 = vadd.f32 %v603_v53, %v602_v52  ;;  %v2286_v52 = vld [vmem:[%s2945_s2] sm:$0xff]   ;;  %v2287_v53 = vld [vmem:[%s2945_s2 + $0xb8] sm:$0xff]  }
 0x2a9   :  { %v607_v10 = vadd.f32 %v606_v8, %v604_v54 }
 0x2ab   :  { %v608_v12 = vadd.f32 %v607_v10, %v605_v9 }
 0x2ad   :  { %v609_v13 = vrot.slane %v608_v12, 4 }
 0x2af   :  { %v610_v14 = vadd.f32 %v609_v13, %v608_v12 }
 0x2b1   :  { %v611_v15 = vrot.slane %v610_v14, 2 }
 0x2b3   :  { %v612_v16 = vadd.f32 %v611_v15, %v610_v14 }
 0x2b5   :  { %v613_v17 = vrot.slane %v612_v16, 1 }
 0x2b7   :  { %v614_v18 = vadd.f32 %v613_v17, %v612_v16 }
 0x2b9   :  { %2087 = vmatmul.mubr.f32.vlgmr.msra.gmra.mxu0 %v614_v18 }
 0x2ba   :  { %2120 = vmatpush3.bf16.msra.mxu0 %v2273_v19 }
 0x2bb   :  { %2121 = vmatprep.subr.bf16.mxu0 %v2275_v20 }
 0x2be   :  { %2122 = vmatpush3.bf16.msra.mxu0 %v2275_v20 }
 0x2bf   :  { %2123 = vmatprep.subr.bf16.mxu0 %v2277_v21 }
 0x2c2   :  { %2124 = vmatpush3.bf16.msra.mxu0 %v2277_v21 }
 0x2c3   :  { %2125 = vmatprep.subr.bf16.mxu0 %v2279_v22 }
 0x2c6   :  { %2126 = vmatpush3.bf16.msra.mxu0 %v2279_v22 }
 0x2c7   :  { %2127 = vmatprep.subr.bf16.mxu0 %v2281_v47 }
 0x2ca   :  { %2128 = vmatpush3.bf16.msra.mxu0 %v2281_v47 }
 0x2cb   :  { %2129 = vmatprep.subr.bf16.mxu0 %v2283_v49 }
 0x2ce   :  { %2130 = vmatpush3.bf16.msra.mxu0 %v2283_v49  ;;  %v2289_v49 = vld [vmem:[%s2945_s2 + $0xa8] sm:$0xff]  }
 0x2cf   :  { %2131 = vmatprep.subr.bf16.mxu0 %v2285_v51 }
 0x2d2   :  { %2132 = vmatpush3.bf16.msra.mxu0 %v2285_v51  ;;  %v2292_v51 = vld [vmem:[%s2945_s2 + $0x90] sm:$0xff]  }
 0x2d3   :  { %2133 = vmatprep.subr.bf16.mxu0 %v2286_v52 }
 0x2d6   :  { %2134 = vmatpush3.bf16.msra.mxu0 %v2286_v52  ;;  %v2293_v52 = vld [vmem:[%s2945_s2 + $0x88] sm:$0xff]  }
 0x2d7   :  { %2159 = vmatprep.subr.mxu0 %v2304_v55 }
 0x379   :  { %v681_v23 = vpop.f32.mrf.mxu0 }
 0x37a   :  { %v685_v27 = vmul.f32 0.001953125, %v681_v23 }
 0x37b   :  { %v2088_v29 = vpop.f32.mrf.mxu0 }
 0x37c   :  { %v686_v31 = vadd.f32 1e-05, %v685_v27 }
 0x37e   :  { %2295 = vrsqrt.f32 %v686_v31 }
 0x38b   :  { %v2296_v33 = vpop.eup %2295 }
 0x38c   :  { %v688_v34 = vmul.f32 %v2296_v33, %v438_v32 }
 0x38e   :  { %2092 = vmatmul.mubr.msk.f32.vlgmr.msra.gmra.mxu1 %vm520_vm8, %v688_v34  ;;  %v689_v37 = vmul.f32 %v688_v34, %v519_v41  ;;  %v2276_v41 = vld [vmem:[%s2945_s2 + $0x60] sm:$0xff]   ;;  %v2288_v34 = vld [vmem:[%s2945_s2 + $0xb0] sm:$0xff]  }
 0x38f   :  { %2095 = vmatpush3.msra.mxu1 %v2654_v39  ;;  %2096 = vmatprep.mubr.msk.f32.mxu1 %vm2305_vm7, %v2304_v55 }
 0x390   :  { %v690_v38 = vsub.f32 %v439_v36, %v689_v37  ;;  %2099 = vmatprep.subr.bf16.mxu1 %v2271_v35 }
 0x392   :  { %2097 = vmatmul.mubr.msk.f32.vlgmr.msra.gmra.mxu1 %vm520_vm8, %v690_v38 }
 0x393   :  { %2100 = vmatpush3.bf16.msra.mxu1 %v2271_v35 }
 0x394   :  { %2101 = vmatprep.subr.bf16.mxu1 %v2272_v40 }
 0x397   :  { %2102 = vmatpush3.bf16.msra.mxu1 %v2272_v40 }
 0x398   :  { %2103 = vmatprep.subr.bf16.mxu1 %v2274_v42 }
 0x39b   :  { %2104 = vmatpush3.bf16.msra.mxu1 %v2274_v42 }
 0x39c   :  { %2105 = vmatprep.subr.bf16.mxu1 %v2276_v41 }
 0x39f   :  { %2106 = vmatpush3.bf16.msra.mxu1 %v2276_v41 }
 0x3a0   :  { %2107 = vmatprep.subr.bf16.mxu1 %v2278_v45 }
 0x3a3   :  { %2108 = vmatpush3.bf16.msra.mxu1 %v2278_v45 }
 0x3a4   :  { %2109 = vmatprep.subr.bf16.mxu1 %v2280_v46 }
 0x3a7   :  { %2110 = vmatpush3.bf16.msra.mxu1 %v2280_v46 }
 0x3a8   :  { %2111 = vmatprep.subr.bf16.mxu1 %v2282_v48 }
 0x3ab   :  { %2112 = vmatpush3.bf16.msra.mxu1 %v2282_v48 }
 0x3ac   :  { %2113 = vmatprep.subr.bf16.mxu1 %v2284_v50 }
 0x3af   :  { %2114 = vmatpush3.bf16.msra.mxu1 %v2284_v50  ;;  %v2290_v50 = vld [vmem:[%s2945_s2 + $0xa0] sm:$0xff]  }
 0x3b0   :  { %2139 = vmatprep.subr.bf16.mxu1 %v2287_v53 }
 0x44e   :  { %v760_v54 = vpop.f32.mrf.mxu1 }
 0x44f   :  { %v840_v8 = vrot.slane %v760_v54, %v2666_v43 }
 0x450   :  { %v2093_v9 = vpop.f32.mrf.mxu1 }
 0x451   :  { %v841_v10 = vmul.f32 %v840_v8, %v2639_v24  ;;  %v842_v13 = vmul.f32 %v840_v8, %v2641_v26  ;;  %v843_v14 = vmul.f32 %v840_v8, %v2643_v28  ;;  %v844_v15 = vmul.f32 %v840_v8, %v2647_v30 }
 0x452   :  { %v833_v12 = vpop.f32.mrf.mxu1 }
 0x453   :  { %v848_v16 = vrot.slane %v833_v12, %v2666_v43 }
 0x454   :  { %v2098_v17 = vpop.f32.mrf.mxu1 }
 0x455   :  { %v849_v18 = vadd.f32 %v848_v16, %v841_v10  ;;  %v850_v19 = vadd.f32 %v848_v16, %v842_v13  ;;  %v851_v20 = vadd.f32 %v848_v16, %v843_v14  ;;  %v852_v21 = vadd.f32 %v848_v16, %v844_v15 }
 0x457   :  { %v2742_v22 = vmax.f32 %v851_v20, 0.0  ;;  %v2744_v23 = vmax.f32 %v852_v21, 0.0  ;;  %v2746_v27 = vmax.f32 %v849_v18, 0.0  ;;  %v854_v24 = vmax.f32 %v850_v19, 0.0 }
 0x459   :  { %v859_v26 = vrot.slane %v2742_v22, 7  ;;  %v899_v28 = vpack.c.bf16 %v854_v24, %v2746_v27  ;;  %v900_v30 = vpack.c.bf16 %v2744_v23, %v2742_v22  ;;  %v857_v29 = vrot.slane %v2746_v27, 7 }
 0x45a   :  { %v858_v31 = vrot.slane %v854_v24, 7  ;;  %v860_v32 = vrot.slane %v2744_v23, 7  ;;  %v869_v33 = vrot.slane %v2746_v27, 1  ;;  %v870_v35 = vrot.slane %v854_v24, 1 }
 0x45b   :  { %2115 = vmatprep.mubr.bf16.mxu1 %v899_v28  ;;  %v871_v36 = vrot.slane %v2742_v22, 1  ;;  %v872_v54 = vrot.slane %v2744_v23, 1 }
 0x45c   :  { %2116 = vmatmul.mubr.bf16.vlgmr.msra.gmra.mxu1 %v900_v30  ;;  %v863_v37 = vsel %vm65_vm0, %v857_v29, %v858_v31  ;;  %v864_v38 = vsel %vm65_vm0, %v860_v32, %v857_v29  ;;  %v861_v40 = vsel %vm65_vm0, %v859_v26, %v860_v32  ;;  %v862_v42 = vsel %vm65_vm0, %v858_v31, %v859_v26 }
 0x45d   :  { %2140 = vmatpush3.bf16.msra.mxu1 %v2287_v53  ;;  %v1771_v41 = vpack.c.bf16 %v863_v37, %v864_v38  ;;  %v874_v45 = vsel %vm78_vm4, %v870_v35, %v871_v36  ;;  %v875_v46 = vsel %vm78_vm4, %v869_v33, %v870_v35  ;;  %v1775_v47 = vpack.c.bf16 %v861_v40, %v862_v42  ;;  %v2294_v53 = vld [vmem:[%s2945_s2 + $0x80] sm:$0xff]  }
 0x45e   :  { %v1803_v48 = vpack.c.bf16 %v874_v45, %v875_v46  ;;  %2141 = vmatprep.subr.bf16.mxu1 %v2288_v34  ;;  %v873_v8 = vsel %vm78_vm4, %v871_v36, %v872_v54  ;;  %v876_v9 = vsel %vm78_vm4, %v872_v54, %v869_v33 }
 0x45f   :  { %2135 = vmatprep.mubr.msk.bf16.mxu0 %vm2423_vm3, %v1771_v41  ;;  %v1807_v10 = vpack.c.bf16 %v876_v9, %v873_v8  ;;  %v1233_v9 = vld [vmem:[%s2949_s6] sm:$0x1] }
 0x460   :  { %2155 = vmatprep.mubr.msk.bf16.mxu1 %vm2457_vm6, %v1803_v48  ;;  %2136 = vmatmul.mubr.msk.bf16.vlgmr.msra.gmra.mxu0 %vm2423_vm3, %v1775_v47 }
 0x461   :  { %2142 = vmatpush3.bf16.msra.mxu1 %v2288_v34  ;;  %2160 = vmatpush3.msra.mxu0 %v2494_v56 }
 0x462   :  { %2143 = vmatprep.subr.bf16.mxu1 %v2289_v49  ;;  %2161 = vmatprep.subr.mxu0 %v2304_v55 }
 0x463   :  { %2162 = vmatpush3.msra.mxu0 %v2499_v57  ;;  %2191 = vmatprep.mubr.msk.f32.mxu0 %vm2305_vm7, %v2304_v55 }
 0x464   :  { %2163 = vmatprep.subr.mxu0 %v2304_v55 }
 0x465   :  { %2144 = vmatpush3.bf16.msra.mxu1 %v2289_v49  ;;  %2164 = vmatpush3.msra.mxu0 %v2513_v58 }
 0x466   :  { %2145 = vmatprep.subr.bf16.mxu1 %v2290_v50  ;;  %2165 = vmatprep.subr.mxu0 %v2304_v55 }
 0x467   :  { %2166 = vmatpush3.msra.mxu0 %v2521_v59 }
 0x468   :  { %2167 = vmatprep.subr.mxu0 %v2304_v55 }
 0x469   :  { %2146 = vmatpush3.bf16.msra.mxu1 %v2290_v50  ;;  %2168 = vmatpush3.msra.mxu0 %v2530_v60 }
 0x46a   :  { %2147 = vmatprep.subr.bf16.mxu1 %v2291_v25  ;;  %2169 = vmatprep.subr.mxu0 %v2304_v55 }
 0x46b   :  { %2170 = vmatpush3.msra.mxu0 %v2539_v61 }
 0x46c   :  { %2171 = vmatprep.subr.mxu0 %v2304_v55 }
 0x46d   :  { %2148 = vmatpush3.bf16.msra.mxu1 %v2291_v25  ;;  %2172 = vmatpush3.msra.mxu0 %v2548_v62 }
 0x46e   :  { %2149 = vmatprep.subr.bf16.mxu1 %v2292_v51  ;;  %2173 = vmatprep.subr.mxu0 %v2304_v55 }
 0x46f   :  { %2174 = vmatpush3.msra.mxu0 %v2557_v63 }
 0x470   :  { %2175 = vmatprep.subr.mxu0 %v2304_v55 }
 0x471   :  { %2150 = vmatpush3.bf16.msra.mxu1 %v2292_v51  ;;  %2176 = vmatpush3.msra.mxu0 %v2566_v0 }
 0x472   :  { %2151 = vmatprep.subr.bf16.mxu1 %v2293_v52  ;;  %2177 = vmatprep.subr.mxu0 %v2304_v55 }
 0x473   :  { %2178 = vmatpush3.msra.mxu0 %v2575_v1 }
 0x474   :  { %2179 = vmatprep.subr.mxu0 %v2304_v55 }
 0x475   :  { %2152 = vmatpush3.bf16.msra.mxu1 %v2293_v52  ;;  %2180 = vmatpush3.msra.mxu0 %v2584_v2 }
 0x476   :  { %2153 = vmatprep.subr.bf16.mxu1 %v2294_v53  ;;  %2181 = vmatprep.subr.mxu0 %v2304_v55 }
 0x477   :  { %2182 = vmatpush3.msra.mxu0 %v2591_v3 }
 0x478   :  { %2183 = vmatprep.subr.mxu0 %v2304_v55 }
 0x479   :  { %2154 = vmatpush3.bf16.msra.mxu1 %v2294_v53  ;;  %2184 = vmatpush3.msra.mxu0 %v2598_v4  ;;  %v1232_v53 = vld [vmem:[%s2948_s5] sm:$0x1] }
 0x47a   :  { %2185 = vmatprep.subr.mxu0 %v2304_v55  ;;  %2199 = vmatprep.subr.mxu1 %v2304_v55 }
 0x47b   :  { %2186 = vmatpush3.msra.mxu0 %v2608_v5 }
 0x47c   :  { %2156 = vmatmul.mubr.msk.bf16.vlgmr.msra.gmra.mxu1 %vm2457_vm6, %v1807_v10  ;;  %2187 = vmatprep.subr.mxu0 %v2304_v55 }
 0x47d   :  { %2188 = vmatpush3.msra.mxu0 %v2617_v6  ;;  %2200 = vmatpush3.msra.mxu1 %v2494_v56 }
 0x47e   :  { %2189 = vmatprep.subr.mxu0 %v2304_v55  ;;  %2201 = vmatprep.subr.mxu1 %v2304_v55 }
 0x47f   :  { %2190 = vmatpush3.msra.mxu0 %v2626_v7  ;;  %2202 = vmatpush3.msra.mxu1 %v2499_v57 }
 0x480   :  { %2194 = vmatprep.subr.mxu0 %v2304_v55  ;;  %2203 = vmatprep.subr.mxu1 %v2304_v55 }
 0x481   :  { %2204 = vmatpush3.msra.mxu1 %v2513_v58  ;;  %2231 = vmatprep.mubr.msk.f32.mxu1 %vm2305_vm7, %v2304_v55 }
 0x482   :  { %2205 = vmatprep.subr.mxu1 %v2304_v55 }
 0x483   :  { %2206 = vmatpush3.msra.mxu1 %v2521_v59 }
 0x484   :  { %2207 = vmatprep.subr.mxu1 %v2304_v55 }
 0x485   :  { %2208 = vmatpush3.msra.mxu1 %v2530_v60 }
 0x486   :  { %2209 = vmatprep.subr.mxu1 %v2304_v55 }
 0x487   :  { %2210 = vmatpush3.msra.mxu1 %v2539_v61 }
 0x488   :  { %2211 = vmatprep.subr.mxu1 %v2304_v55 }
 0x489   :  { %2212 = vmatpush3.msra.mxu1 %v2548_v62 }
 0x48a   :  { %2213 = vmatprep.subr.mxu1 %v2304_v55 }
 0x48b   :  { %2214 = vmatpush3.msra.mxu1 %v2557_v63 }
 0x48c   :  { %2215 = vmatprep.subr.mxu1 %v2304_v55 }
 0x48d   :  { %2216 = vmatpush3.msra.mxu1 %v2566_v0 }
 0x48e   :  { %2217 = vmatprep.subr.mxu1 %v2304_v55 }
 0x48f   :  { %2218 = vmatpush3.msra.mxu1 %v2575_v1 }
 0x490   :  { %2219 = vmatprep.subr.mxu1 %v2304_v55 }
 0x491   :  { %2220 = vmatpush3.msra.mxu1 %v2584_v2 }
 0x492   :  { %2221 = vmatprep.subr.mxu1 %v2304_v55 }
 0x493   :  { %2222 = vmatpush3.msra.mxu1 %v2591_v3 }
 0x494   :  { %2223 = vmatprep.subr.mxu1 %v2304_v55 }
 0x495   :  { %2224 = vmatpush3.msra.mxu1 %v2598_v4 }
 0x496   :  { %2225 = vmatprep.subr.mxu1 %v2304_v55 }
 0x497   :  { %2226 = vmatpush3.msra.mxu1 %v2608_v5 }
 0x498   :  { %2227 = vmatprep.subr.mxu1 %v2304_v55 }
 0x499   :  { %2228 = vmatpush3.msra.mxu1 %v2617_v6 }
 0x49a   :  { %2229 = vmatprep.subr.mxu1 %v2304_v55 }
 0x49b   :  { %2230 = vmatpush3.msra.mxu1 %v2626_v7 }
 0x51c   :  { %v2117_v11 = vpop.f32.mrf.mxu1 }
 0x51e   :  { %v1000_v44 = vpop.f32.mrf.mxu1 }
 0x520   :  { %v2137_v56 = vpop.f32.mrf.mxu0  ;;  %v2118_v57 = vpop.f32.mrf.mxu1 }
 0x521   :  { %v1106_v4 = vadd.f32 %v2137_v56, %v2117_v11 }
 0x522   :  { %v1097_v58 = vpop.f32.mrf.mxu0  ;;  %v1003_v59 = vpop.f32.mrf.mxu1 }
 0x523   :  { %v1098_v1 = vadd.f32 %v1097_v58, %v1000_v44 }
 0x524   :  { %v2138_v60 = vpop.f32.mrf.mxu0 }
 0x525   :  { %v1109_v7 = vadd.f32 %v2138_v60, %v2118_v57 }
 0x526   :  { %v1100_v62 = vpop.f32.mrf.mxu0 }
 0x527   :  { %v1101_v2 = vadd.f32 %v1100_v62, %v1003_v59 }
 0x53c   :  { %v2157_v61 = vpop.f32.mrf.mxu1 }
 0x53d   :  { %v2878_v12 = vadd.f32 %v2157_v61, %v1106_v4 }
 0x53e   :  { %v1213_v63 = vpop.f32.mrf.mxu1 }
 0x53f   :  { %v2874_v5 = vadd.f32 %v1213_v63, %v1098_v1 }
 0x540   :  { %v2158_v0 = vpop.f32.mrf.mxu1 }
 0x541   :  { %v2882_v14 = vadd.f32 %v2158_v0, %v1109_v7  ;;  %v2301_v7 = vld [vmem:[%s2942_s0 + $0x10] sm:$0xff] }
 0x542   :  { %v1216_v3 = vpop.f32.mrf.mxu1 }
 0x543   :  { %v2876_v6 = vadd.f32 %v1216_v3, %v1101_v2  ;;  %v2299_v3 = vld [vmem:[%s2942_s0] sm:$0xff] }
 0x545   :  { %v1234_v13 = vadd.f32 %v2876_v6, %v2874_v5 }
 0x547   :  { %v1235_v15 = vadd.f32 %v1234_v13, %v2878_v12 }
 0x549   :  { %v1236_v16 = vadd.f32 %v1235_v15, %v2882_v14 }
 0x54b   :  { %v1237_v17 = vrot.slane %v1236_v16, 4 }
 0x54d   :  { %v1238_v18 = vadd.f32 %v1237_v17, %v1236_v16 }
 0x54f   :  { %v1239_v19 = vrot.slane %v1238_v18, 2 }
 0x551   :  { %v1240_v20 = vadd.f32 %v1239_v19, %v1238_v18 }
 0x553   :  { %v1241_v21 = vrot.slane %v1240_v20, 1 }
 0x555   :  { %v1242_v22 = vadd.f32 %v1241_v21, %v1240_v20 }
 0x557   :  { %2192 = vmatmul.mubr.f32.vlgmr.msra.gmra.mxu0 %v1242_v22 }
 0x558   :  { %2195 = vmatpush3.msra.mxu0 %v2654_v39  ;;  %2196 = vmatprep.mubr.msk.f32.mxu0 %vm2305_vm7, %v2304_v55 }
 0x559   :  { %2234 = vmatprep.subr.mxu0 %v2304_v55 }
 0x617   :  { %v1309_v23 = vpop.f32.mrf.mxu0 }
 0x618   :  { %v1313_v27 = vmul.f32 0.001953125, %v1309_v23 }
 0x619   :  { %v2193_v24 = vpop.f32.mrf.mxu0 }
 0x61a   :  { %2197 = vmatmul.mubr.msk.f32.vlgmr.msra.gmra.mxu0 %vm520_vm8, %v1313_v27 }
 0x61b   :  { %2235 = vmatpush3.msra.mxu0 %v2654_v39  ;;  %2236 = vmatprep.mubr.msk.f32.mxu0 %vm2305_vm7, %v2304_v55 }
 0x61c   :  { %2239 = vmatprep.subr.mxu0 %v2304_v55 }
 0x6da   :  { %v1383_v26 = vpop.f32.mrf.mxu0 }
 0x6db   :  { %v1390_v28 = vrot.slane %v1383_v26, %v2666_v43 }
 0x6dc   :  { %v2198_v30 = vpop.f32.mrf.mxu0 }
 0x6dd   :  { %v1391_v29 = vsub.f32 %v2874_v5, %v1390_v28  ;;  %v1392_v31 = vsub.f32 %v2876_v6, %v1390_v28  ;;  %v1393_v32 = vsub.f32 %v2878_v12, %v1390_v28  ;;  %v1394_v33 = vsub.f32 %v2882_v14, %v1390_v28 }
 0x6df   :  { %v1395_v34 = vmul.f32 %v1391_v29, %v1391_v29  ;;  %v1396_v35 = vmul.f32 %v1392_v31, %v1392_v31  ;;  %v1397_v36 = vmul.f32 %v1393_v32, %v1393_v32  ;;  %v1398_v38 = vmul.f32 %v1394_v33, %v1394_v33 }
 0x6e1   :  { %v1399_v37 = vadd.f32 %v1396_v35, %v1395_v34 }
 0x6e3   :  { %v1400_v40 = vadd.f32 %v1399_v37, %v1397_v36 }
 0x6e5   :  { %v1401_v42 = vadd.f32 %v1400_v40, %v1398_v38 }
 0x6e7   :  { %v1402_v41 = vrot.slane %v1401_v42, 4 }
 0x6e9   :  { %v1403_v45 = vadd.f32 %v1402_v41, %v1401_v42 }
 0x6eb   :  { %v1404_v46 = vrot.slane %v1403_v45, 2 }
 0x6ed   :  { %v1405_v47 = vadd.f32 %v1404_v46, %v1403_v45 }
 0x6ef   :  { %v1406_v48 = vrot.slane %v1405_v47, 1 }
 0x6f1   :  { %v1407_v49 = vadd.f32 %v1406_v48, %v1405_v47 }
 0x6f3   :  { %2232 = vmatmul.mubr.f32.vlgmr.msra.gmra.mxu1 %v1407_v49 }
 0x7b3   :  { %v1474_v50 = vpop.f32.mrf.mxu1 }
 0x7b4   :  { %v1478_v25 = vmul.f32 0.001953125, %v1474_v50 }
 0x7b5   :  { %v2233_v51 = vpop.f32.mrf.mxu1 }
 0x7b6   :  { %v1479_v52 = vadd.f32 1e-05, %v1478_v25 }
 0x7b8   :  { %2297 = vrsqrt.f32 %v1479_v52 }
 0x7c5   :  { %v2298_v54 = vpop.eup %2297 }
 0x7c6   :  { %v1481_v8 = vmul.f32 %v2298_v54, %v1232_v53 }
 0x7c8   :  { %2237 = vmatmul.mubr.msk.f32.vlgmr.msra.gmra.mxu0 %vm520_vm8, %v1481_v8  ;;  %v1482_v10 = vmul.f32 %v1481_v8, %v1313_v27 }
 0x7c9   :  { %2240 = vmatpush3.msra.mxu0 %v2654_v39  ;;  %2241 = vmatprep.mubr.msk.f32.mxu0 %vm2305_vm7, %v2304_v55 }
 0x7ca   :  { %v1483_v11 = vsub.f32 %v1233_v9, %v1482_v10 }
 0x7cc   :  { %2242 = vmatmul.mubr.msk.f32.vlgmr.msra.gmra.mxu0 %vm520_vm8, %v1483_v11 }
 0x888   :  { %v1553_v44 = vpop.f32.mrf.mxu0 }
 0x889   :  { %v1633_v56 = vrot.slane %v1553_v44, %v2666_v43 }
 0x88a   :  { %v2238_v57 = vpop.f32.mrf.mxu0 }
 0x88b   :  { %v1634_v58 = vmul.f32 %v1633_v56, %v2874_v5  ;;  %v1635_v60 = vmul.f32 %v1633_v56, %v2876_v6  ;;  %v1636_v61 = vmul.f32 %v1633_v56, %v2878_v12  ;;  %v1637_v62 = vmul.f32 %v1633_v56, %v2882_v14  ;;  %v2300_v5 = vld [vmem:[%s2942_s0 + $0x8] sm:$0xff]  ;;  %v2302_v12 = vld [vmem:[%s2942_s0 + $0x18] sm:$0xff] }
 0x88c   :  { %v1626_v59 = vpop.f32.mrf.mxu0 }
 0x88d   :  { %v1641_v39 = vrot.slane %v1626_v59, %v2666_v43 }
 0x88e   :  { %v2243_v63 = vpop.f32.mrf.mxu0 }
 0x88f   :  { %v1642_v55 = vadd.f32 %v1641_v39, %v1634_v58  ;;  %v1643_v0 = vadd.f32 %v1641_v39, %v1635_v60  ;;  %v1644_v1 = vadd.f32 %v1641_v39, %v1636_v61  ;;  %v1645_v2 = vadd.f32 %v1641_v39, %v1637_v62 }
 0x891   :  { %v1646_v4 = vadd.f32 %v2299_v3, %v1642_v55  ;;  %v1647_v6 = vadd.f32 %v2300_v5, %v1643_v0  ;;  %v1648_v43 = vadd.f32 %v2301_v7, %v1644_v1  ;;  %v1649_v13 = vadd.f32 %v2302_v12, %v1645_v2 }
 0x893   :  { %v1650_v14 = vmax.f32 %v1646_v4, 0.0  ;;  %v1651_v15 = vmax.f32 %v1647_v6, 0.0  ;;  %v1652_v16 = vmax.f32 %v1648_v43, 0.0  ;;  %v1653_v17 = vmax.f32 %v1649_v13, 0.0 }
 0x895   :  { %1654 = vst [vmem:[%s2950_s9] sm:$0xff] %v1650_v14  ;;  %1655 = vst [vmem:[%s2950_s9 + $0x8] sm:$0xff] %v1651_v15 }
 0x896   :  { %1656 = vst [vmem:[%s2950_s9 + $0x10] sm:$0xff] %v1652_v16  ;;  %1657 = vst [vmem:[%s2950_s9 + $0x18] sm:$0xff] %v1653_v17 }

</bundles_post_ra>
